<compile_context>
chip_gen: v7x
topology: tpu7x:2x2x1
jax: 0.10.0
libtpu: 0.0.40
codegen_flags: <defaults>
</compile_context>

<pallas_src>
import functools

import jax
import jax.numpy as jnp
from jax.experimental import pallas as pl
from jax.experimental.pallas import tpu as pltpu

EPS = 1e-8


def _js_kernel(u_ref, b_ref, v_ref, p_ref, out_ref, rho_ref,
               pw_sq, pw_vs, ph_sq, ph_vs, *, win_size):
    # Block shapes: u/b/v/out: (1, C, H, W); p/rho: (1, 1, H, W)
    # Scratch: pw_*: (H, W + 2r) f32 ; ph_*: (H + 2r, W) f32
    _, C, H, W = u_ref.shape
    r = win_size // 2

    # ---- per-pixel channel reductions, streamed channel-by-channel --------
    sq = jnp.zeros((H, W), jnp.float32)
    vs = jnp.zeros((H, W), jnp.float32)
    for c in range(C):
        d = u_ref[0, c].astype(jnp.float32) - b_ref[0, c].astype(jnp.float32)
        sq = sq + d * d
        vs = vs + v_ref[0, c].astype(jnp.float32)

    # ---- separable box filter via zero-padded VMEM scratch -----------------
    # W-direction pass: data lives in columns [r, r+W); border columns stay 0,
    # which implements the zero-padding for free (no masks, no rolls).
    if r > 0:
        zcol = jnp.zeros((H, r), jnp.float32)
        pw_sq[:, pl.ds(0, r)] = zcol
        pw_sq[:, pl.ds(W + r, r)] = zcol
        pw_vs[:, pl.ds(0, r)] = zcol
        pw_vs[:, pl.ds(W + r, r)] = zcol
    pw_sq[:, pl.ds(r, W)] = sq
    pw_vs[:, pl.ds(r, W)] = vs

    row_sq = jnp.zeros((H, W), jnp.float32)
    row_vs = jnp.zeros((H, W), jnp.float32)
    for dx in range(win_size):           # static, unrolled
        row_sq = row_sq + pw_sq[:, pl.ds(dx, W)]
        row_vs = row_vs + pw_vs[:, pl.ds(dx, W)]

    # H-direction pass: same trick on the sublane axis.
    if r > 0:
        zrow = jnp.zeros((r, W), jnp.float32)
        ph_sq[pl.ds(0, r), :] = zrow
        ph_sq[pl.ds(H + r, r), :] = zrow
        ph_vs[pl.ds(0, r), :] = zrow
        ph_vs[pl.ds(H + r, r), :] = zrow
    ph_sq[pl.ds(r, H), :] = row_sq
    ph_vs[pl.ds(r, H), :] = row_vs

    box_sq = jnp.zeros((H, W), jnp.float32)
    box_vs = jnp.zeros((H, W), jnp.float32)
    for dy in range(win_size):           # static, unrolled
        box_sq = box_sq + ph_sq[pl.ds(dy, H), :]
        box_vs = box_vs + ph_vs[pl.ds(dy, H), :]

    # ---- shrinkage factor and combined output ------------------------------
    p = p_ref[0, 0].astype(jnp.float32)
    dim = float(win_size * win_size * C)
    num = p * ((dim - 2.0) * box_vs)
    # Approximate reciprocal runs on the EUP (otherwise idle slot); accuracy
    # is well within what clip(0, 1) needs.
    rho = num * pl.reciprocal(jnp.maximum(box_sq, EPS), approx=True)
    rho = jnp.clip(rho, 0.0, 1.0)
    rho_ref[0, 0] = rho.astype(rho_ref.dtype)

    one_minus_rho = 1.0 - rho
    # Stream the output channel-by-channel (keeps live footprint small).
    for c in range(C):
        u_c = u_ref[0, c].astype(jnp.float32)
        b_c = b_ref[0, c].astype(jnp.float32)
        out_ref[0, c] = (b_c + one_minus_rho * (u_c - b_c)).astype(out_ref.dtype)


def js_opt_forward(unbiased, biased, var, param, win_size):
    """Pallas TPU implementation of JS_opt.forward. Inputs are NCHW."""
    B, C, H, W = unbiased.shape
    assert biased.shape == (B, C, H, W) and var.shape == (B, C, H, W)
    assert param.shape == (B, 1, H, W)
    r = win_size // 2

    kernel = functools.partial(_js_kernel, win_size=win_size)

    grid_spec = pltpu.PrefetchScalarGridSpec(
        num_scalar_prefetch=0,
        grid=(B,),
        in_specs=[
            pl.BlockSpec((1, C, H, W), lambda b: (b, 0, 0, 0)),
            pl.BlockSpec((1, C, H, W), lambda b: (b, 0, 0, 0)),
            pl.BlockSpec((1, C, H, W), lambda b: (b, 0, 0, 0)),
            pl.BlockSpec((1, 1, H, W), lambda b: (b, 0, 0, 0)),
        ],
        out_specs=[
            pl.BlockSpec((1, C, H, W), lambda b: (b, 0, 0, 0)),
            pl.BlockSpec((1, 1, H, W), lambda b: (b, 0, 0, 0)),
        ],
        scratch_shapes=[
            pltpu.VMEM((H, W + 2 * r), jnp.float32),   # W-pass padded sq
            pltpu.VMEM((H, W + 2 * r), jnp.float32),   # W-pass padded var-sum
            pltpu.VMEM((H + 2 * r, W), jnp.float32),   # H-pass padded sq
            pltpu.VMEM((H + 2 * r, W), jnp.float32),   # H-pass padded var-sum
        ],
    )

    out_shape = (
        jax.ShapeDtypeStruct((B, C, H, W), unbiased.dtype),
        jax.ShapeDtypeStruct((B, 1, H, W), jnp.float32),
    )

    return pl.pallas_call(
        kernel,
        grid_spec=grid_spec,
        out_shape=out_shape,
        compiler_params=pltpu.CompilerParams(
            dimension_semantics=("parallel",),
            vmem_limit_bytes=64 * 1024 * 1024,
        ),
    )(unbiased, biased, var, param)


def js_opt_forward_ref(unbiased, biased, var, param, win_size):
    """Pure-JAX reference of the same formula (for correctness check)."""
    B, C, H, W = unbiased.shape
    r = win_size // 2
    diff = unbiased - biased
    sq = jnp.sum(diff * diff, axis=1)   # (B, H, W)
    vs = jnp.sum(var, axis=1)           # (B, H, W)

    def box(m):
        mp = jnp.pad(m, ((0, 0), (r, r), (r, r)))
        acc = jnp.zeros_like(m)
        for dy in range(win_size):
            for dx in range(win_size):
                acc = acc + mp[:, dy:dy + H, dx:dx + W]
        return acc

    dim = float(win_size * win_size * C)
    rho = param[:, 0] * (dim - 2.0) * box(vs) / jnp.maximum(box(sq), EPS)
    rho = jnp.clip(rho, 0.0, 1.0)
    out = biased + (1.0 - rho)[:, None, :, :] * diff
    return out, rho[:, None, :, :]


class JS_opt:
    """JAX counterpart of the PyTorch JS_opt module (forward only)."""

    def __init__(self, win_size):
        self.win_size = win_size

    def __call__(self, unbiased, biased, var, param):
        return js_opt_forward(unbiased, biased, var, param, self.win_size)


if __name__ == "__main__":
    B, C, H, W = 2, 3, 16, 16
    win_size = 3

    key = jax.random.PRNGKey(0)
    k1, k2, k3, k4 = jax.random.split(key, 4)
    unbiased = jax.random.normal(k1, (B, C, H, W), dtype=jnp.float32)
    biased = unbiased + 0.1 * jax.random.normal(k2, (B, C, H, W),
                                                dtype=jnp.float32)
    var = jnp.abs(jax.random.normal(k3, (B, C, H, W), dtype=jnp.float32)) * 0.01
    param = jax.nn.sigmoid(jax.random.normal(k4, (B, 1, H, W),
                                             dtype=jnp.float32))

    module = JS_opt(win_size)
    out_img, rho = module(unbiased, biased, var, param)
    out_img = jax.block_until_ready(out_img)
    rho = jax.block_until_ready(rho)

    out_ref, rho_ref = js_opt_forward_ref(unbiased, biased, var, param,
                                          win_size)
    assert out_img.shape == (B, C, H, W) and rho.shape == (B, 1, H, W)
    # Tolerance accounts for the approximate (EUP) reciprocal used for rho;
    # the window sums themselves are exact f32 additions.
    assert jnp.allclose(out_img, out_ref, atol=2e-3, rtol=2e-3)
    assert jnp.allclose(rho, rho_ref, atol=2e-3, rtol=2e-3)

    print("KERNEL_OK")
</pallas_src>

<mosaic_0001>
module attributes {stable_mosaic.version = 11 : i64} {
  func.func @_js_kernel(%arg0: i32, %arg1: memref<1x3x16x16xf32, #tpu.memory_space<vmem>>, %arg2: memref<1x3x16x16xf32, #tpu.memory_space<vmem>>, %arg3: memref<1x3x16x16xf32, #tpu.memory_space<vmem>>, %arg4: memref<1x1x16x16xf32, #tpu.memory_space<vmem>>, %arg5: memref<1x3x16x16xf32, #tpu.memory_space<vmem>>, %arg6: memref<1x1x16x16xf32, #tpu.memory_space<vmem>>, %arg7: memref<16x18xf32, #tpu.memory_space<vmem>>, %arg8: memref<16x18xf32, #tpu.memory_space<vmem>>, %arg9: memref<18x16xf32, #tpu.memory_space<vmem>>, %arg10: memref<18x16xf32, #tpu.memory_space<vmem>>) attributes {dimension_semantics = [#tpu.dimension_semantics<parallel>], iteration_bounds = array<i64: 2>, scalar_prefetch = 0 : i64, scratch_operands = 4 : i64, tpu.core_type = #tpu.core_type<tc>, window_params = [{transform_indices = @transform_0, window_bounds = array<i64: 1, 3, 16, 16>}, {transform_indices = @transform_1, window_bounds = array<i64: 1, 3, 16, 16>}, {transform_indices = @transform_2, window_bounds = array<i64: 1, 3, 16, 16>}, {transform_indices = @transform_3, window_bounds = array<i64: 1, 1, 16, 16>}, {transform_indices = @transform_4, window_bounds = array<i64: 1, 3, 16, 16>}, {transform_indices = @transform_5, window_bounds = array<i64: 1, 1, 16, 16>}]} {
    %cst = arith.constant 0.000000e+00 : f32
    %0 = vector.broadcast %cst : f32 to vector<16x16xf32>
    %cst_0 = arith.constant 0.000000e+00 : f32
    %1 = vector.broadcast %cst_0 : f32 to vector<16x16xf32>
    %c0 = arith.constant 0 : index
    %c0_1 = arith.constant 0 : index
    %c0_2 = arith.constant 0 : index
    %c0_3 = arith.constant 0 : index
    %2 = vector.load %arg1[%c0, %c0_1, %c0_2, %c0_3] : memref<1x3x16x16xf32, #tpu.memory_space<vmem>>, vector<1x1x16x16xf32>
    %3 = vector.shape_cast %2 : vector<1x1x16x16xf32> to vector<16x16xf32>
    %c0_4 = arith.constant 0 : index
    %c0_5 = arith.constant 0 : index
    %c0_6 = arith.constant 0 : index
    %c0_7 = arith.constant 0 : index
    %4 = vector.load %arg2[%c0_4, %c0_5, %c0_6, %c0_7] : memref<1x3x16x16xf32, #tpu.memory_space<vmem>>, vector<1x1x16x16xf32>
    %5 = vector.shape_cast %4 : vector<1x1x16x16xf32> to vector<16x16xf32>
    %6 = arith.subf %3, %5 : vector<16x16xf32>
    %7 = arith.mulf %6, %6 : vector<16x16xf32>
    %8 = arith.addf %0, %7 : vector<16x16xf32>
    %c0_8 = arith.constant 0 : index
    %c0_9 = arith.constant 0 : index
    %c0_10 = arith.constant 0 : index
    %c0_11 = arith.constant 0 : index
    %9 = vector.load %arg3[%c0_8, %c0_9, %c0_10, %c0_11] : memref<1x3x16x16xf32, #tpu.memory_space<vmem>>, vector<1x1x16x16xf32>
    %10 = vector.shape_cast %9 : vector<1x1x16x16xf32> to vector<16x16xf32>
    %11 = arith.addf %1, %10 : vector<16x16xf32>
    %c0_12 = arith.constant 0 : index
    %c1 = arith.constant 1 : index
    %c0_13 = arith.constant 0 : index
    %c0_14 = arith.constant 0 : index
    %12 = vector.load %arg1[%c0_12, %c1, %c0_13, %c0_14] : memref<1x3x16x16xf32, #tpu.memory_space<vmem>>, vector<1x1x16x16xf32>
    %13 = vector.shape_cast %12 : vector<1x1x16x16xf32> to vector<16x16xf32>
    %c0_15 = arith.constant 0 : index
    %c1_16 = arith.constant 1 : index
    %c0_17 = arith.constant 0 : index
    %c0_18 = arith.constant 0 : index
    %14 = vector.load %arg2[%c0_15, %c1_16, %c0_17, %c0_18] : memref<1x3x16x16xf32, #tpu.memory_space<vmem>>, vector<1x1x16x16xf32>
    %15 = vector.shape_cast %14 : vector<1x1x16x16xf32> to vector<16x16xf32>
    %16 = arith.subf %13, %15 : vector<16x16xf32>
    %17 = arith.mulf %16, %16 : vector<16x16xf32>
    %18 = arith.addf %8, %17 : vector<16x16xf32>
    %c0_19 = arith.constant 0 : index
    %c1_20 = arith.constant 1 : index
    %c0_21 = arith.constant 0 : index
    %c0_22 = arith.constant 0 : index
    %19 = vector.load %arg3[%c0_19, %c1_20, %c0_21, %c0_22] : memref<1x3x16x16xf32, #tpu.memory_space<vmem>>, vector<1x1x16x16xf32>
    %20 = vector.shape_cast %19 : vector<1x1x16x16xf32> to vector<16x16xf32>
    %21 = arith.addf %11, %20 : vector<16x16xf32>
    %c0_23 = arith.constant 0 : index
    %c2 = arith.constant 2 : index
    %c0_24 = arith.constant 0 : index
    %c0_25 = arith.constant 0 : index
    %22 = vector.load %arg1[%c0_23, %c2, %c0_24, %c0_25] : memref<1x3x16x16xf32, #tpu.memory_space<vmem>>, vector<1x1x16x16xf32>
    %23 = vector.shape_cast %22 : vector<1x1x16x16xf32> to vector<16x16xf32>
    %c0_26 = arith.constant 0 : index
    %c2_27 = arith.constant 2 : index
    %c0_28 = arith.constant 0 : index
    %c0_29 = arith.constant 0 : index
    %24 = vector.load %arg2[%c0_26, %c2_27, %c0_28, %c0_29] : memref<1x3x16x16xf32, #tpu.memory_space<vmem>>, vector<1x1x16x16xf32>
    %25 = vector.shape_cast %24 : vector<1x1x16x16xf32> to vector<16x16xf32>
    %26 = arith.subf %23, %25 : vector<16x16xf32>
    %27 = arith.mulf %26, %26 : vector<16x16xf32>
    %28 = arith.addf %18, %27 : vector<16x16xf32>
    %c0_30 = arith.constant 0 : index
    %c2_31 = arith.constant 2 : index
    %c0_32 = arith.constant 0 : index
    %c0_33 = arith.constant 0 : index
    %29 = vector.load %arg3[%c0_30, %c2_31, %c0_32, %c0_33] : memref<1x3x16x16xf32, #tpu.memory_space<vmem>>, vector<1x1x16x16xf32>
    %30 = vector.shape_cast %29 : vector<1x1x16x16xf32> to vector<16x16xf32>
    %31 = arith.addf %21, %30 : vector<16x16xf32>
    %cst_34 = arith.constant 0.000000e+00 : f32
    %32 = vector.broadcast %cst_34 : f32 to vector<16x1xf32>
    %c0_35 = arith.constant 0 : index
    %c0_36 = arith.constant 0 : index
    %33 = vector.load %arg7[%c0_35, %c0_36] : memref<16x18xf32, #tpu.memory_space<vmem>>, vector<16x1xf32>
    tpu.vector_store %arg7[%c0_35, %c0_36], %32 {strides = array<i32>} : memref<16x18xf32, #tpu.memory_space<vmem>>, vector<16x1xf32>,
    %c0_37 = arith.constant 0 : index
    %c17 = arith.constant 17 : index
    %34 = vector.load %arg7[%c0_37, %c17] : memref<16x18xf32, #tpu.memory_space<vmem>>, vector<16x1xf32>
    tpu.vector_store %arg7[%c0_37, %c17], %32 {strides = array<i32>} : memref<16x18xf32, #tpu.memory_space<vmem>>, vector<16x1xf32>,
    %c0_38 = arith.constant 0 : index
    %c0_39 = arith.constant 0 : index
    %35 = vector.load %arg8[%c0_38, %c0_39] : memref<16x18xf32, #tpu.memory_space<vmem>>, vector<16x1xf32>
    tpu.vector_store %arg8[%c0_38, %c0_39], %32 {strides = array<i32>} : memref<16x18xf32, #tpu.memory_space<vmem>>, vector<16x1xf32>,
    %c0_40 = arith.constant 0 : index
    %c17_41 = arith.constant 17 : index
    %36 = vector.load %arg8[%c0_40, %c17_41] : memref<16x18xf32, #tpu.memory_space<vmem>>, vector<16x1xf32>
    tpu.vector_store %arg8[%c0_40, %c17_41], %32 {strides = array<i32>} : memref<16x18xf32, #tpu.memory_space<vmem>>, vector<16x1xf32>,
    %c0_42 = arith.constant 0 : index
    %c1_43 = arith.constant 1 : index
    %37 = vector.load %arg7[%c0_42, %c1_43] : memref<16x18xf32, #tpu.memory_space<vmem>>, vector<16x16xf32>
    tpu.vector_store %arg7[%c0_42, %c1_43], %28 {strides = array<i32>} : memref<16x18xf32, #tpu.memory_space<vmem>>, vector<16x16xf32>,
    %c0_44 = arith.constant 0 : index
    %c1_45 = arith.constant 1 : index
    %38 = vector.load %arg8[%c0_44, %c1_45] : memref<16x18xf32, #tpu.memory_space<vmem>>, vector<16x16xf32>
    tpu.vector_store %arg8[%c0_44, %c1_45], %31 {strides = array<i32>} : memref<16x18xf32, #tpu.memory_space<vmem>>, vector<16x16xf32>,
    %cst_46 = arith.constant 0.000000e+00 : f32
    %39 = vector.broadcast %cst_46 : f32 to vector<16x16xf32>
    %cst_47 = arith.constant 0.000000e+00 : f32
    %40 = vector.broadcast %cst_47 : f32 to vector<16x16xf32>
    %c0_48 = arith.constant 0 : index
    %c0_49 = arith.constant 0 : index
    %41 = vector.load %arg7[%c0_48, %c0_49] : memref<16x18xf32, #tpu.memory_space<vmem>>, vector<16x16xf32>
    %42 = arith.addf %39, %41 : vector<16x16xf32>
    %c0_50 = arith.constant 0 : index
    %c0_51 = arith.constant 0 : index
    %43 = vector.load %arg8[%c0_50, %c0_51] : memref<16x18xf32, #tpu.memory_space<vmem>>, vector<16x16xf32>
    %44 = arith.addf %40, %43 : vector<16x16xf32>
    %c0_52 = arith.constant 0 : index
    %c1_53 = arith.constant 1 : index
    %45 = vector.load %arg7[%c0_52, %c1_53] : memref<16x18xf32, #tpu.memory_space<vmem>>, vector<16x16xf32>
    %46 = arith.addf %42, %45 : vector<16x16xf32>
    %c0_54 = arith.constant 0 : index
    %c1_55 = arith.constant 1 : index
    %47 = vector.load %arg8[%c0_54, %c1_55] : memref<16x18xf32, #tpu.memory_space<vmem>>, vector<16x16xf32>
    %48 = arith.addf %44, %47 : vector<16x16xf32>
    %c0_56 = arith.constant 0 : index
    %c2_57 = arith.constant 2 : index
    %49 = vector.load %arg7[%c0_56, %c2_57] : memref<16x18xf32, #tpu.memory_space<vmem>>, vector<16x16xf32>
    %50 = arith.addf %46, %49 : vector<16x16xf32>
    %c0_58 = arith.constant 0 : index
    %c2_59 = arith.constant 2 : index
    %51 = vector.load %arg8[%c0_58, %c2_59] : memref<16x18xf32, #tpu.memory_space<vmem>>, vector<16x16xf32>
    %52 = arith.addf %48, %51 : vector<16x16xf32>
    %cst_60 = arith.constant 0.000000e+00 : f32
    %53 = vector.broadcast %cst_60 : f32 to vector<1x16xf32>
    %c0_61 = arith.constant 0 : index
    %c0_62 = arith.constant 0 : index
    %54 = vector.load %arg9[%c0_61, %c0_62] : memref<18x16xf32, #tpu.memory_space<vmem>>, vector<1x16xf32>
    tpu.vector_store %arg9[%c0_61, %c0_62], %53 {strides = array<i32>} : memref<18x16xf32, #tpu.memory_space<vmem>>, vector<1x16xf32>,
    %c17_63 = arith.constant 17 : index
    %c0_64 = arith.constant 0 : index
    %55 = vector.load %arg9[%c17_63, %c0_64] : memref<18x16xf32, #tpu.memory_space<vmem>>, vector<1x16xf32>
    tpu.vector_store %arg9[%c17_63, %c0_64], %53 {strides = array<i32>} : memref<18x16xf32, #tpu.memory_space<vmem>>, vector<1x16xf32>,
    %c0_65 = arith.constant 0 : index
    %c0_66 = arith.constant 0 : index
    %56 = vector.load %arg10[%c0_65, %c0_66] : memref<18x16xf32, #tpu.memory_space<vmem>>, vector<1x16xf32>
    tpu.vector_store %arg10[%c0_65, %c0_66], %53 {strides = array<i32>} : memref<18x16xf32, #tpu.memory_space<vmem>>, vector<1x16xf32>,
    %c17_67 = arith.constant 17 : index
    %c0_68 = arith.constant 0 : index
    %57 = vector.load %arg10[%c17_67, %c0_68] : memref<18x16xf32, #tpu.memory_space<vmem>>, vector<1x16xf32>
    tpu.vector_store %arg10[%c17_67, %c0_68], %53 {strides = array<i32>} : memref<18x16xf32, #tpu.memory_space<vmem>>, vector<1x16xf32>,
    %c1_69 = arith.constant 1 : index
    %c0_70 = arith.constant 0 : index
    %58 = vector.load %arg9[%c1_69, %c0_70] : memref<18x16xf32, #tpu.memory_space<vmem>>, vector<16x16xf32>
    tpu.vector_store %arg9[%c1_69, %c0_70], %50 {strides = array<i32>} : memref<18x16xf32, #tpu.memory_space<vmem>>, vector<16x16xf32>,
    %c1_71 = arith.constant 1 : index
    %c0_72 = arith.constant 0 : index
    %59 = vector.load %arg10[%c1_71, %c0_72] : memref<18x16xf32, #tpu.memory_space<vmem>>, vector<16x16xf32>
    tpu.vector_store %arg10[%c1_71, %c0_72], %52 {strides = array<i32>} : memref<18x16xf32, #tpu.memory_space<vmem>>, vector<16x16xf32>,
    %cst_73 = arith.constant 0.000000e+00 : f32
    %60 = vector.broadcast %cst_73 : f32 to vector<16x16xf32>
    %cst_74 = arith.constant 0.000000e+00 : f32
    %61 = vector.broadcast %cst_74 : f32 to vector<16x16xf32>
    %c0_75 = arith.constant 0 : index
    %c0_76 = arith.constant 0 : index
    %62 = vector.load %arg9[%c0_75, %c0_76] : memref<18x16xf32, #tpu.memory_space<vmem>>, vector<16x16xf32>
    %63 = arith.addf %60, %62 : vector<16x16xf32>
    %c0_77 = arith.constant 0 : index
    %c0_78 = arith.constant 0 : index
    %64 = vector.load %arg10[%c0_77, %c0_78] : memref<18x16xf32, #tpu.memory_space<vmem>>, vector<16x16xf32>
    %65 = arith.addf %61, %64 : vector<16x16xf32>
    %c1_79 = arith.constant 1 : index
    %c0_80 = arith.constant 0 : index
    %66 = vector.load %arg9[%c1_79, %c0_80] : memref<18x16xf32, #tpu.memory_space<vmem>>, vector<16x16xf32>
    %67 = arith.addf %63, %66 : vector<16x16xf32>
    %c1_81 = arith.constant 1 : index
    %c0_82 = arith.constant 0 : index
    %68 = vector.load %arg10[%c1_81, %c0_82] : memref<18x16xf32, #tpu.memory_space<vmem>>, vector<16x16xf32>
    %69 = arith.addf %65, %68 : vector<16x16xf32>
    %c2_83 = arith.constant 2 : index
    %c0_84 = arith.constant 0 : index
    %70 = vector.load %arg9[%c2_83, %c0_84] : memref<18x16xf32, #tpu.memory_space<vmem>>, vector<16x16xf32>
    %71 = arith.addf %67, %70 : vector<16x16xf32>
    %c2_85 = arith.constant 2 : index
    %c0_86 = arith.constant 0 : index
    %72 = vector.load %arg10[%c2_85, %c0_86] : memref<18x16xf32, #tpu.memory_space<vmem>>, vector<16x16xf32>
    %73 = arith.addf %69, %72 : vector<16x16xf32>
    %c0_87 = arith.constant 0 : index
    %c0_88 = arith.constant 0 : index
    %c0_89 = arith.constant 0 : index
    %c0_90 = arith.constant 0 : index
    %74 = vector.load %arg4[%c0_87, %c0_88, %c0_89, %c0_90] : memref<1x1x16x16xf32, #tpu.memory_space<vmem>>, vector<1x1x16x16xf32>
    %75 = vector.shape_cast %74 : vector<1x1x16x16xf32> to vector<16x16xf32>
    %cst_91 = arith.constant 2.500000e+01 : f32
    %76 = vector.broadcast %cst_91 : f32 to vector<16x16xf32>
    %77 = arith.mulf %76, %73 : vector<16x16xf32>
    %78 = arith.mulf %75, %77 : vector<16x16xf32>
    %cst_92 = arith.constant 9.99999993E-9 : f32
    %79 = vector.broadcast %cst_92 : f32 to vector<16x16xf32>
    %80 = arith.maximumf %71, %79 : vector<16x16xf32>
    %81 = tpu.reciprocal %80 {approx = true} : vector<16x16xf32> -> vector<16x16xf32>
    %82 = arith.mulf %78, %81 : vector<16x16xf32>
    %cst_93 = arith.constant 0.000000e+00 : f32
    %cst_94 = arith.constant 1.000000e+00 : f32
    %83 = vector.broadcast %cst_93 : f32 to vector<16x16xf32>
    %84 = arith.maximumf %83, %82 : vector<16x16xf32>
    %85 = vector.broadcast %cst_94 : f32 to vector<16x16xf32>
    %86 = arith.minimumf %85, %84 : vector<16x16xf32>
    %c0_95 = arith.constant 0 : index
    %c0_96 = arith.constant 0 : index
    %c0_97 = arith.constant 0 : index
    %c0_98 = arith.constant 0 : index
    %87 = vector.load %arg6[%c0_95, %c0_96, %c0_97, %c0_98] : memref<1x1x16x16xf32, #tpu.memory_space<vmem>>, vector<1x1x16x16xf32>
    %88 = vector.shape_cast %87 : vector<1x1x16x16xf32> to vector<16x16xf32>
    %89 = vector.shape_cast %86 : vector<16x16xf32> to vector<1x1x16x16xf32>
    tpu.vector_store %arg6[%c0_95, %c0_96, %c0_97, %c0_98], %89 {strides = array<i32>} : memref<1x1x16x16xf32, #tpu.memory_space<vmem>>, vector<1x1x16x16xf32>,
    %cst_99 = arith.constant 1.000000e+00 : f32
    %90 = vector.broadcast %cst_99 : f32 to vector<16x16xf32>
    %91 = arith.subf %90, %86 : vector<16x16xf32>
    %c0_100 = arith.constant 0 : index
    %c0_101 = arith.constant 0 : index
    %c0_102 = arith.constant 0 : index
    %c0_103 = arith.constant 0 : index
    %92 = vector.load %arg1[%c0_100, %c0_101, %c0_102, %c0_103] : memref<1x3x16x16xf32, #tpu.memory_space<vmem>>, vector<1x1x16x16xf32>
    %93 = vector.shape_cast %92 : vector<1x1x16x16xf32> to vector<16x16xf32>
    %c0_104 = arith.constant 0 : index
    %c0_105 = arith.constant 0 : index
    %c0_106 = arith.constant 0 : index
    %c0_107 = arith.constant 0 : index
    %94 = vector.load %arg2[%c0_104, %c0_105, %c0_106, %c0_107] : memref<1x3x16x16xf32, #tpu.memory_space<vmem>>, vector<1x1x16x16xf32>
    %95 = vector.shape_cast %94 : vector<1x1x16x16xf32> to vector<16x16xf32>
    %96 = arith.subf %93, %95 : vector<16x16xf32>
    %97 = arith.mulf %91, %96 : vector<16x16xf32>
    %98 = arith.addf %95, %97 : vector<16x16xf32>
    %c0_108 = arith.constant 0 : index
    %c0_109 = arith.constant 0 : index
    %c0_110 = arith.constant 0 : index
    %c0_111 = arith.constant 0 : index
    %99 = vector.load %arg5[%c0_108, %c0_109, %c0_110, %c0_111] : memref<1x3x16x16xf32, #tpu.memory_space<vmem>>, vector<1x1x16x16xf32>
    %100 = vector.shape_cast %99 : vector<1x1x16x16xf32> to vector<16x16xf32>
    %101 = vector.shape_cast %98 : vector<16x16xf32> to vector<1x1x16x16xf32>
    tpu.vector_store %arg5[%c0_108, %c0_109, %c0_110, %c0_111], %101 {strides = array<i32>} : memref<1x3x16x16xf32, #tpu.memory_space<vmem>>, vector<1x1x16x16xf32>,
    %c0_112 = arith.constant 0 : index
    %c1_113 = arith.constant 1 : index
    %c0_114 = arith.constant 0 : index
    %c0_115 = arith.constant 0 : index
    %102 = vector.load %arg1[%c0_112, %c1_113, %c0_114, %c0_115] : memref<1x3x16x16xf32, #tpu.memory_space<vmem>>, vector<1x1x16x16xf32>
    %103 = vector.shape_cast %102 : vector<1x1x16x16xf32> to vector<16x16xf32>
    %c0_116 = arith.constant 0 : index
    %c1_117 = arith.constant 1 : index
    %c0_118 = arith.constant 0 : index
    %c0_119 = arith.constant 0 : index
    %104 = vector.load %arg2[%c0_116, %c1_117, %c0_118, %c0_119] : memref<1x3x16x16xf32, #tpu.memory_space<vmem>>, vector<1x1x16x16xf32>
    %105 = vector.shape_cast %104 : vector<1x1x16x16xf32> to vector<16x16xf32>
    %106 = arith.subf %103, %105 : vector<16x16xf32>
    %107 = arith.mulf %91, %106 : vector<16x16xf32>
    %108 = arith.addf %105, %107 : vector<16x16xf32>
    %c0_120 = arith.constant 0 : index
    %c1_121 = arith.constant 1 : index
    %c0_122 = arith.constant 0 : index
    %c0_123 = arith.constant 0 : index
    %109 = vector.load %arg5[%c0_120, %c1_121, %c0_122, %c0_123] : memref<1x3x16x16xf32, #tpu.memory_space<vmem>>, vector<1x1x16x16xf32>
    %110 = vector.shape_cast %109 : vector<1x1x16x16xf32> to vector<16x16xf32>
    %111 = vector.shape_cast %108 : vector<16x16xf32> to vector<1x1x16x16xf32>
    tpu.vector_store %arg5[%c0_120, %c1_121, %c0_122, %c0_123], %111 {strides = array<i32>} : memref<1x3x16x16xf32, #tpu.memory_space<vmem>>, vector<1x1x16x16xf32>,
    %c0_124 = arith.constant 0 : index
    %c2_125 = arith.constant 2 : index
    %c0_126 = arith.constant 0 : index
    %c0_127 = arith.constant 0 : index
    %112 = vector.load %arg1[%c0_124, %c2_125, %c0_126, %c0_127] : memref<1x3x16x16xf32, #tpu.memory_space<vmem>>, vector<1x1x16x16xf32>
    %113 = vector.shape_cast %112 : vector<1x1x16x16xf32> to vector<16x16xf32>
    %c0_128 = arith.constant 0 : index
    %c2_129 = arith.constant 2 : index
    %c0_130 = arith.constant 0 : index
    %c0_131 = arith.constant 0 : index
    %114 = vector.load %arg2[%c0_128, %c2_129, %c0_130, %c0_131] : memref<1x3x16x16xf32, #tpu.memory_space<vmem>>, vector<1x1x16x16xf32>
    %115 = vector.shape_cast %114 : vector<1x1x16x16xf32> to vector<16x16xf32>
    %116 = arith.subf %113, %115 : vector<16x16xf32>
    %117 = arith.mulf %91, %116 : vector<16x16xf32>
    %118 = arith.addf %115, %117 : vector<16x16xf32>
    %c0_132 = arith.constant 0 : index
    %c2_133 = arith.constant 2 : index
    %c0_134 = arith.constant 0 : index
    %c0_135 = arith.constant 0 : index
    %119 = vector.load %arg5[%c0_132, %c2_133, %c0_134, %c0_135] : memref<1x3x16x16xf32, #tpu.memory_space<vmem>>, vector<1x1x16x16xf32>
    %120 = vector.shape_cast %119 : vector<1x1x16x16xf32> to vector<16x16xf32>
    %121 = vector.shape_cast %118 : vector<16x16xf32> to vector<1x1x16x16xf32>
    tpu.vector_store %arg5[%c0_132, %c2_133, %c0_134, %c0_135], %121 {strides = array<i32>} : memref<1x3x16x16xf32, #tpu.memory_space<vmem>>, vector<1x1x16x16xf32>,
    return
  }
  func.func @transform_0(%arg0: i32) -> (i32, i32, i32, i32) {
    %c0_i32 = arith.constant 0 : i32
    %c0_i32_0 = arith.constant 0 : i32
    %c0_i32_1 = arith.constant 0 : i32
    %c0_i32_2 = arith.constant 0 : i32
    return %arg0, %c0_i32, %c0_i32_0, %c0_i32_1 : i32, i32, i32, i32
  }
  func.func @transform_1(%arg0: i32) -> (i32, i32, i32, i32) {
    %c0_i32 = arith.constant 0 : i32
    %c0_i32_0 = arith.constant 0 : i32
    %c0_i32_1 = arith.constant 0 : i32
    %c0_i32_2 = arith.constant 0 : i32
    return %arg0, %c0_i32, %c0_i32_0, %c0_i32_1 : i32, i32, i32, i32
  }
  func.func @transform_2(%arg0: i32) -> (i32, i32, i32, i32) {
    %c0_i32 = arith.constant 0 : i32
    %c0_i32_0 = arith.constant 0 : i32
    %c0_i32_1 = arith.constant 0 : i32
    %c0_i32_2 = arith.constant 0 : i32
    return %arg0, %c0_i32, %c0_i32_0, %c0_i32_1 : i32, i32, i32, i32
  }
  func.func @transform_3(%arg0: i32) -> (i32, i32, i32, i32) {
    %c0_i32 = arith.constant 0 : i32
    %c0_i32_0 = arith.constant 0 : i32
    %c0_i32_1 = arith.constant 0 : i32
    %c0_i32_2 = arith.constant 0 : i32
    return %arg0, %c0_i32, %c0_i32_0, %c0_i32_1 : i32, i32, i32, i32
  }
  func.func @transform_4(%arg0: i32) -> (i32, i32, i32, i32) {
    %c0_i32 = arith.constant 0 : i32
    %c0_i32_0 = arith.constant 0 : i32
    %c0_i32_1 = arith.constant 0 : i32
    %c0_i32_2 = arith.constant 0 : i32
    return %arg0, %c0_i32, %c0_i32_0, %c0_i32_1 : i32, i32, i32, i32
  }
  func.func @transform_5(%arg0: i32) -> (i32, i32, i32, i32) {
    %c0_i32 = arith.constant 0 : i32
    %c0_i32_0 = arith.constant 0 : i32
    %c0_i32_1 = arith.constant 0 : i32
    %c0_i32_2 = arith.constant 0 : i32
    return %arg0, %c0_i32, %c0_i32_0, %c0_i32_1 : i32, i32, i32, i32
  }
}

</mosaic_0001>

<bundles_post_ra>
// kernel: tpu_custom_call.1
= control target key start
LH: loop header
LB: loop body
LE: loop exit
PB: predicated region body
PF: predicated region fallthrough
CT: control target
= control target key end

     0   :  { %s1634_s0 = inlined_call_operand.hbm [shape: f32[2,3,16,16], index: 0, kind: input, shape index: {}]   ;;  %s1635_s1 = inlined_call_operand.hbm [shape: f32[2,3,16,16], index: 1, kind: input, shape index: {}]   ;;  %s1636_s2 = inlined_call_operand.hbm [shape: f32[2,3,16,16], index: 2, kind: input, shape index: {}]   ;;  %s1637_s3 = inlined_call_operand.hbm [shape: f32[2,1,16,16], index: 3, kind: input, shape index: {}]   ;;  %s1638_s4 = inlined_call_operand.hbm [shape: f32[2,3,16,16], index: 4, kind: output, shape index: {0}]   ;;  %s1639_s5 = inlined_call_operand.hbm [shape: f32[2,1,16,16], index: 5, kind: output, shape index: {1}]  }
   0x1   :  { %1647 = sst [smem:[#allocation24_spill]] %s1634_s0 }
   0x2   :  { %1648 = sst [smem:[#allocation25_spill]] %s1635_s1 }
   0x3   :  { %11 = vsyncpa [#allocation7], 0 }
   0x4   :  { %13 = vsyncpa [#allocation7 + $0x1], 0 }
   0x5   :  { %14 = vsyncpa [#allocation10], 0 }
   0x6   :  { %16 = vsyncpa [#allocation10 + $0x1], 0 }
   0x7   :  { %17 = vsyncpa [#allocation13], 0 }
   0x8   :  { %19 = vsyncpa [#allocation13 + $0x1], 0 }
   0x9   :  { %20 = vsyncpa [#allocation8], 0 }
   0xa   :  { %22 = vsyncpa [#allocation8 + $0x1], 0 }
   0xb   :  { %23 = vsyncpa [#allocation16], 0 }
   0xc   :  { %25 = vsyncpa [#allocation16 + $0x1], 0  ;;  %s1194_s18 = smov 0   ;;  %s1196_s19 = smov 0  }
   0xd   :  { %s1198_s20 = smov 0   ;;  %s1200_s21 = smov 0  }
   0xe LB: > { %1649 = sst [smem:[#allocation22_spill]] %s1144_s20  ;;  %s1215_s22 = sadd.s32 4294967295, %s1148_s21   ;;  %s1148_s21 = sphi %s1200_s21, %s1671_s21   ;;  %s1144_s20 = sphi %s1198_s20, %s1668_s20   ;;  %s1140_s19 = sphi %s1196_s19, %s1670_s19   ;;  %s1136_s18 = sphi %s1194_s18, %s1669_s18  }
   0xf   : > { %s792_s23 = sadd.s32 4294967294, %s1148_s21   ;;  %s1219_s24 = sadd.s32 1, %s1148_s21  }
  0x10   : > { %s38_s25 = sadd.s32 1, %s1144_s20  ;;  %s35_s26 = ssub.s32 %s1148_s21, %s1219_s24 }
  0x11   : > { %p45_p0 = scmp.ne.s32.totalorder %s1144_s20, %s1140_s19  ;;  %p36_p1 = scmp.eq.s32.totalorder %s35_s26, 0 }
  0x12   : > { %p46_p2 = scmp.eq.s32.totalorder %s1148_s21, 0  ;;  %p51_p3 = scmp.ne.s32.totalorder %s1140_s19, %s1136_s18 }
  0x13   : > { %p52_p4 = scmp.eq.s32.totalorder %s1215_s22, 0  ;;  %p153_p7 = scmp.eq.s32.totalorder %s1215_s22, 1 }
  0x14   : > { %s1231_s27 = scalar_select %p36_p1, %s1144_s20, %s38_s25  }
  0x15   : > { %p47_p5 = por %p46_p2, %p45_p0  ;;  %p1233_p6 = por %p52_p4, %p51_p3 }
  0x16   : > { %1650 = sst [smem:[#allocation23_spill]] %s1231_s27  ;;  %p159_p8 = scmp.eq.s32.totalorder %s792_s23, 1 }
  0x17   : > { %s1651_s28 = scalar_select %p1233_p6, 1, 0 }
  0x18   : > { %p876_p10 = scmp.lt.s32.totalorder %s1148_s21, 2  ;;  %p1240_p11 = por %p153_p7, %p45_p0 }
  0x19   : > { %p1244_p12 = por %p159_p8, %p51_p3  ;;  %s1249_s6 = sand.u32 1, %s1144_s20  }
  0x1a   : > { %s1652_s29 = scalar_select %p1240_p11, 1, 0 }
  0x1b   : > { %s1653_s30 = scalar_select %p1244_p12, 1, 0 }
  0x1c   : > { %s1252_s7 = smul.u32 768, %s1148_s21  ;;  %p1257_p13 = pnand %p876_p10, %p47_p5 }
  0x1d   : > { %s1255_s8 = smul.u32 48, %s1249_s6  ;;  %s226_s10 = sand.u32 1, %s1148_s21  }
  0x1e   : > { %s1655_s1 = sld [smem:[#allocation25_spill]]  ;;  %s1272_s16 = scalar_lea.sflag [#allocation10], %s226_s10 }
  0x1f   : > { %s230_s14 = scalar_lea.vmem [#allocation9], %s1255_s8  ;;  %p1278_p2 = pneg %p1257_p13 }
  0x20   : > { %s237_s15 = sshll.u32 %s230_s14, 4  ;;  %s1269_s15 = int_to_ptr.vmem [resolvable:$true] %s237_s15 }
  0x24   : > { %s1266_s13 = scalar_lea.hbm %s1655_s1, %s1252_s7  ;;  %s927_s11 = scalar_lea.hbm %s1655_s1, 1536 }
  0x25   : > { %s922_s17 = scalar_lea.hbm %s1266_s13, 768  ;;  %p928_p5 = scmp.lt.u32.totalorder %s1266_s13, %s1655_s1 }
  0x26   : > { %p923_p1 = scmp.ne.s32.totalorder %s1266_s13, %s922_s17  ;;  %p929_p7 = scmp.lt.u32.totalorder %s927_s11, %s922_s17 }
  0x27   : > { %p931_p10 = scmp.lt.u32.totalorder %s922_s17, %s1266_s13 }
  0x28   : > { %p925_p3 = pnand %p1278_p2, %p923_p1  ;;  %p930_p8 = por %p929_p7, %p928_p5 }
  0x2a   : > { %p926_p4 = pneg %p925_p3  ;;  %p932_p9 = por %p931_p10, %p930_p8 }
  0x2c   : > { %p933_p0 = pnand %p932_p9, %p926_p4 }
  0x2e   : > { %936 = shalt.err (!%p933_p0)
}
  0x2f   : > { %s937_s10 = scalar_lea.vmem %s1269_s15, 768  ;;  %s1150_s25 = smov [#allocation9]  }
  0x30   : > { %p938_p1 = scmp.ne.s32.totalorder %s1269_s15, %s937_s10  ;;  %s942_s26 = sshll.u32 %s1150_s25, 4  ;;  %s943_s26 = int_to_ptr.vmem [resolvable:$false] %s942_s26 }
  0x31   : > { %s944_s12 = scalar_lea.vmem %s943_s26, 1536  ;;  %p945_p11 = scmp.lt.s32.totalorder %s1269_s15, %s943_s26 }
  0x32   : > { %p940_p3 = pnand %p938_p1, %p1278_p2  ;;  %p946_p6 = scmp.lt.s32.totalorder %s944_s12, %s937_s10 }
  0x34   : > { %p941_p12 = pneg %p940_p3  ;;  %p947_p5 = por %p946_p6, %p945_p11 }
  0x36   : > { %p948_p7 = pnand %p947_p5, %p941_p12 }
  0x38   : > { %951 = shalt.err (!%p948_p7)
}
  0x39   : > { %s1642_s17 = smov 128   ;;  %s1644_s11 = smov 8  }
  0x3a   : > { %862 = dma.hbm_to_vmem [thread:$0]  (!%p1257_p13), %s1266_s13, 768, %s1269_s15, %s1272_s16, %s1642_s17, %s1642_s17, %s1644_s11  }
  0x3b   : > { %p287_p6 = scmp.lt.s32.totalorder %s1148_s21, 3  ;;  %s1657_s0 = sld [smem:[#allocation24_spill]] }
  0x3c   : > { %p1658_p9 = scmp.ge.s32.totalorder %s1148_s21, 1  ;;  %s209_s12 = scalar_lea.vmem [#allocation6], %s1255_s8 }
  0x3d   : > { %s216_s1 = sshll.u32 %s209_s12, 4  ;;  %s206_s13 = scalar_lea.sflag [#allocation7], %s1249_s6  ;;  %s1319_s1 = int_to_ptr.vmem [resolvable:$true] %s216_s1 }
  0x3e   : > { %p1314_p11 = pnand %p1658_p9, %p287_p6 }
  0x40   : > { %s1659_s26 = scalar_select %p1314_p11, 1, 0 }
  0x41   : > { %s1310_s25 = scalar_lea.hbm %s1657_s0, %s1252_s7  ;;  %s957_s17 = scalar_lea.hbm %s1657_s0, 1536 }
  0x42   : > { %s952_s15 = scalar_lea.hbm %s1310_s25, 768  ;;  %p958_p8 = scmp.lt.u32.totalorder %s1310_s25, %s1657_s0 }
  0x43   : > { %p953_p12 = scmp.ne.s32.totalorder %s1310_s25, %s952_s15  ;;  %p959_p10 = scmp.lt.u32.totalorder %s957_s17, %s952_s15 }
  0x44   : > { %p961_p3 = scmp.lt.u32.totalorder %s952_s15, %s1310_s25 }
  0x45   : > { %p955_p0 = pnand %p953_p12, %p1278_p2  ;;  %p960_p1 = por %p959_p10, %p958_p8 }
  0x47   : > { %p956_p4 = pneg %p955_p0  ;;  %p962_p5 = por %p961_p3, %p960_p1 }
  0x49   : > { %p963_p7 = pnand %p962_p5, %p956_p4 }
  0x4b   : > { %966 = shalt.err (!%p963_p7)
}
  0x4c   : > { %s967_s12 = scalar_lea.vmem %s1319_s1, 768  ;;  %s1153_s14 = smov [#allocation6]  }
  0x4d   : > { %p968_p6 = scmp.ne.s32.totalorder %s1319_s1, %s967_s12  ;;  %s972_s10 = sshll.u32 %s1153_s14, 4  ;;  %s973_s10 = int_to_ptr.vmem [resolvable:$false] %s972_s10 }
  0x4e   : > { %s974_s27 = scalar_lea.vmem %s973_s10, 1536  ;;  %p975_p0 = scmp.lt.s32.totalorder %s1319_s1, %s973_s10 }
  0x4f   : > { %p970_p9 = pnand %p968_p6, %p1278_p2  ;;  %p976_p11 = scmp.lt.s32.totalorder %s974_s27, %s967_s12 }
  0x51   : > { %p971_p12 = pneg %p970_p9  ;;  %p977_p8 = por %p976_p11, %p975_p0 }
  0x53   : > { %p978_p10 = pnand %p977_p8, %p971_p12 }
  0x55   : > { %981 = shalt.err (!%p978_p10)
}
  0x56   : > { %s1660_s17 = smov 8   ;;  %s1661_s11 = smov 128  }
  0x57   : > { %859 = dma.hbm_to_vmem [thread:$0]  (!%p1257_p13), %s1310_s25, 768, %s1319_s1, %s206_s13, %s1661_s11, %s1661_s11, %s1660_s17  }
  0x58   : > { %s1352_s12 = scalar_lea.hbm %s1636_s2, %s1252_s7  ;;  %s251_s10 = scalar_lea.vmem [#allocation11], %s1255_s8 }
  0x59   : > { %s258_s27 = sshll.u32 %s251_s10, 4  ;;  %s982_s0 = scalar_lea.hbm %s1352_s12, 768  ;;  %s1355_s27 = int_to_ptr.vmem [resolvable:$true] %s258_s27 }
  0x5a   : > { %p983_p11 = scmp.ne.s32.totalorder %s1352_s12, %s982_s0  ;;  %s987_s25 = scalar_lea.hbm %s1636_s2, 1536 }
  0x5b   : > { %p988_p3 = scmp.lt.u32.totalorder %s1352_s12, %s1636_s2  ;;  %p989_p5 = scmp.lt.u32.totalorder %s987_s25, %s982_s0 }
  0x5c   : > { %p985_p4 = pnand %p983_p11, %p1278_p2  ;;  %p991_p6 = scmp.lt.u32.totalorder %s982_s0, %s1352_s12 }
  0x5d   : > { %p990_p7 = por %p989_p5, %p988_p3 }
  0x5e   : > { %p986_p1 = pneg %p985_p4 }
  0x5f   : > { %p992_p9 = por %p991_p6, %p990_p7 }
  0x61   : > { %p993_p12 = pnand %p992_p9, %p986_p1 }
  0x63   : > { %996 = shalt.err (!%p993_p12)
}
  0x64   : > { %s997_s8 = scalar_lea.vmem %s1355_s27, 768  ;;  %s1154_s20 = smov [#allocation11]  }
  0x65   : > { %p998_p0 = scmp.ne.s32.totalorder %s1355_s27, %s997_s8  ;;  %s1002_s15 = sshll.u32 %s1154_s20, 4  ;;  %s1003_s15 = int_to_ptr.vmem [resolvable:$false] %s1002_s15 }
  0x66   : > { %s1004_s14 = scalar_lea.vmem %s1003_s15, 1536  ;;  %p1005_p11 = scmp.lt.s32.totalorder %s1355_s27, %s1003_s15 }
  0x67   : > { %p1000_p8 = pnand %p998_p0, %p1278_p2  ;;  %p1006_p4 = scmp.lt.s32.totalorder %s1004_s14, %s997_s8 }
  0x69   : > { %p1001_p10 = pneg %p1000_p8  ;;  %p1007_p3 = por %p1006_p4, %p1005_p11 }
  0x6b   : > { %p1008_p5 = pnand %p1007_p3, %p1001_p10 }
  0x6d   : > { %1011 = shalt.err (!%p1008_p5)
}
  0x6e   : > { %865 = dma.hbm_to_vmem [thread:$0]  (!%p1257_p13), %s1352_s12, 768, %s1355_s27, %s1272_s16, %s1661_s11, %s1661_s11, %s1660_s17  }
  0x6f   : > { %s798_s0 = sshll.u32 %s1249_s6, 4  ;;  %s834_s10 = sshll.u32 %s1148_s21, 8 }
  0x70   : > { %s1387_s13 = scalar_lea.hbm %s1637_s3, %s834_s10  ;;  %s272_s7 = scalar_lea.vmem [#allocation12], %s798_s0 }
  0x71   : > { %s279_s8 = sshll.u32 %s272_s7, 4  ;;  %s269_s20 = scalar_lea.sflag [#allocation13], %s1249_s6  ;;  %s1389_s8 = int_to_ptr.vmem [resolvable:$true] %s279_s8 }
  0x72   : > { %s1012_s15 = scalar_lea.hbm %s1387_s13, 256  ;;  %s1017_s27 = scalar_lea.hbm %s1637_s3, 512 }
  0x73   : > { %p1013_p1 = scmp.ne.s32.totalorder %s1387_s13, %s1012_s15  ;;  %p1018_p9 = scmp.lt.u32.totalorder %s1387_s13, %s1637_s3 }
  0x74   : > { %p1019_p12 = scmp.lt.u32.totalorder %s1017_s27, %s1012_s15  ;;  %p1021_p8 = scmp.lt.u32.totalorder %s1012_s15, %s1387_s13 }
  0x75   : > { %p1015_p7 = pnand %p1013_p1, %p1278_p2 }
  0x76   : > { %p1020_p0 = por %p1019_p12, %p1018_p9 }
  0x77   : > { %p1016_p6 = pneg %p1015_p7 }
  0x78   : > { %p1022_p10 = por %p1021_p8, %p1020_p0 }
  0x7a   : > { %p1023_p11 = pnand %p1022_p10, %p1016_p6 }
  0x7c   : > { %1026 = shalt.err (!%p1023_p11)
}
  0x7d   : > { %s1027_s0 = scalar_lea.vmem %s1389_s8, 256  ;;  %s1155_s1 = smov [#allocation12]  }
  0x7e   : > { %p1028_p4 = scmp.ne.s32.totalorder %s1389_s8, %s1027_s0  ;;  %s1032_s25 = sshll.u32 %s1155_s1, 4  ;;  %s1033_s25 = int_to_ptr.vmem [resolvable:$false] %s1032_s25 }
  0x7f   : > { %s1034_s7 = scalar_lea.vmem %s1033_s25, 512  ;;  %p1035_p1 = scmp.lt.s32.totalorder %s1389_s8, %s1033_s25 }
  0x80   : > { %p1030_p3 = pnand %p1028_p4, %p1278_p2  ;;  %p1036_p7 = scmp.lt.s32.totalorder %s1034_s7, %s1027_s0 }
  0x82   : > { %p1031_p5 = pneg %p1030_p3  ;;  %p1037_p9 = por %p1036_p7, %p1035_p1 }
  0x84   : > { %p1038_p12 = pnand %p1037_p9, %p1031_p5 }
  0x86   : > { %1041 = shalt.err (!%p1038_p12)
}
  0x87   : > { %868 = dma.hbm_to_vmem [thread:$0]  (!%p1257_p13), %s1387_s13, 256, %s1389_s8, %s269_s20, %s1661_s11, %s1661_s11, %s1660_s17  }
  0x88   : > { %p1662_p2 = scmp.ne.s32.totalorder %s1659_s26, 0 }
  0x89   : > { %s1421_s23 = sand.u32 (!%p1662_p2), 1, %s1140_s19   ;;  %p1663_p6 = scmp.ne.s32.totalorder (!%p1662_p2), %s1651_s28, 0 }
  0x8a   : > { %291 = sbr.rel (%p1662_p2) target bundleno = 483 (0x1e3), region = 36  ;;  %s294_s9 = scalar_lea.sflag (!%p1662_p2), [#allocation7], %s1421_s23 }
  0x8b   : > { %s1424_s15 = smul.u32 (!%p1662_p2), 48, %s1421_s23 }
  0x8d   : > { %s1428_s16 = scalar_lea.vmem (!%p1662_p2), [#allocation6], %s1424_s15 }
  0x91   : > { %1115 = dma.done.wait (%p1663_p6), %s294_s9, 768  }
  0x92   : > { %1117 = vsyncadd (%p1663_p6), %s294_s9, 4294966528  ;;  %s302_s6 = sand.u32 1, %s1215_s22   ;;  %s1436_s17 = scalar_lea.vmem [#allocation9], %s1424_s15 }
  0x93   : > { %s303_s26 = scalar_lea.sflag [#allocation10], %s302_s6 }
  0x94   : > { %1119 = dma.done.wait (%p1663_p6), %s303_s26, 1536  }
  0x95   : > { %1121 = vsyncadd (%p1663_p6), %s303_s26, 4294965760  ;;  %s802_s11 = sshll.u32 %s1421_s23, 4  ;;  %s1444_s13 = scalar_lea.vmem [#allocation11], %s1424_s15 }
  0x96   : > { %s321_s8 = scalar_lea.sflag [#allocation13], %s1421_s23  ;;  %s1449_s20 = scalar_lea.vmem [#allocation12], %s802_s11 }
  0x97   : > { %1123 = dma.done.wait (%p1663_p6), %s321_s8, 256  }
  0x98   : > { %1125 = vsyncadd (%p1663_p6), %s321_s8, 4294967040  ;;  %vm419_vm0 = vcmask 7168   ;;  %vm422_vm1 = vcmask 146568   ;;  %v1156_v0 = vmov 0.0   ;;  %v371_v1 = vld [vmem:[%s1428_s16] sm:$0xff]  ;;  %v804_v3 = vld [vmem:[%s1428_s16 + $0x10] sm:$0xff] }
  0x99   : > { %420 = vst.msk [vmem:[#allocation2] sm:$0xff] %vm419_vm0, %v1156_v0  ;;  %421 = vst.msk [vmem:[#allocation2 + $0x8] sm:$0xff] %vm419_vm0, %v1156_v0  ;;  %v1457_v2 = vld [vmem:[%s1436_s17] sm:$0xff]  ;;  %v1464_v5 = vld [vmem:[%s1436_s17 + $0x10] sm:$0xff]  ;;  %s1157_s28 = smov 1   ;;  %vm437_vm2 = vcmask 138248  }
  0x9a   : > { %425 = vst.msk [vmem:[#allocation3] sm:$0xff] %vm419_vm0, %v1156_v0  ;;  %426 = vst.msk [vmem:[#allocation3 + $0x8] sm:$0xff] %vm419_vm0, %v1156_v0  ;;  %v1461_v4 = vsub.f32 %v371_v1, %v1457_v2  ;;  %v810_v6 = vld [vmem:[%s1428_s16 + $0x20] sm:$0xff]  ;;  %v1471_v8 = vsub.f32 %v804_v3, %v1464_v5  ;;  %v372_v10 = vld [vmem:[%s1428_s16 + $0x8] sm:$0xff]  ;;  %vm494_vm3 = vcmask 122880   ;;  %s1158_s12 = smov 127  }
  0x9b   : > { %423 = vst.msk [vmem:[#allocation2] sm:$0xff] %vm422_vm1, %v1156_v0  ;;  %424 = vst.msk [vmem:[#allocation2 + $0x8] sm:$0xff] %vm422_vm1, %v1156_v0  ;;  %v1468_v7 = vld [vmem:[%s1436_s17 + $0x20] sm:$0xff]  ;;  %v1478_v11 = vld [vmem:[%s1436_s17 + $0x8] sm:$0xff]  ;;  %s1159_s27 = smov 126   ;;  %vm499_vm4 = vcmask 130048  }
  0x9c   : > { %427 = vst.msk [vmem:[#allocation3] sm:$0xff] %vm422_vm1, %v1156_v0  ;;  %428 = vst.msk [vmem:[#allocation3 + $0x8] sm:$0xff] %vm422_vm1, %v1156_v0  ;;  %v1474_v9 = vsub.f32 %v810_v6, %v1468_v7  ;;  %v805_v12 = vld [vmem:[%s1428_s16 + $0x18] sm:$0xff]  ;;  %v377_v13 = vmul.f32 %v1461_v4, %v1461_v4  ;;  %v1484_v14 = vsub.f32 %v372_v10, %v1478_v11  ;;  %v811_v16 = vld [vmem:[%s1428_s16 + $0x28] sm:$0xff]  ;;  %s835_s14 = sshll.u32 %s1215_s22, 8  ;;  %s370_s10 = scalar_lea.vmem [#allocation15], %s802_s11 }
  0x9d   : > { %v1487_v15 = vld [vmem:[%s1436_s17 + $0x18] sm:$0xff]  ;;  %v1491_v17 = vld [vmem:[%s1436_s17 + $0x28] sm:$0xff]  ;;  %v393_v18 = vmul.f32 %v1471_v8, %v1471_v8  ;;  %v381_v22 = vld [vmem:[%s1444_s13] sm:$0xff]  ;;  %495 = vst.msk [vmem:[#allocation4] sm:$0x1] %vm494_vm3, %v1156_v0  ;;  %s621_s0 = sshll.u32 %s370_s10, 4  ;;  %s1528_s7 = scalar_lea.hbm %s1639_s5, %s835_s14  ;;  %s1530_s0 = int_to_ptr.vmem [resolvable:$true] %s621_s0 }
  0x9e   : > { %v410_v19 = vmul.f32 %v1474_v9, %v1474_v9  ;;  %v1498_v20 = vsub.f32 %v805_v12, %v1487_v15  ;;  %v1501_v21 = vsub.f32 %v811_v16, %v1491_v17  ;;  %v808_v23 = vld [vmem:[%s1444_s13 + $0x10] sm:$0xff]  ;;  %v814_v24 = vld [vmem:[%s1444_s13 + $0x20] sm:$0xff]  ;;  %v378_v25 = vmul.f32 %v1484_v14, %v1484_v14  ;;  %v382_v27 = vld [vmem:[%s1444_s13 + $0x8] sm:$0xff]  ;;  %496 = vst.msk [vmem:[#allocation4 + $0x11] sm:$0x1] %vm494_vm3, %v1156_v0  ;;  %s843_s9 = smul.u32 768, %s1215_s22 }
  0x9f   : > { %v400_v26 = vadd.f32 %v808_v23, %v381_v22  ;;  %v809_v28 = vld [vmem:[%s1444_s13 + $0x18] sm:$0xff]  ;;  %v395_v29 = vadd.f32 %v393_v18, %v377_v13  ;;  %v815_v33 = vld [vmem:[%s1444_s13 + $0x28] sm:$0xff]  ;;  %497 = vst.msk [vmem:[#allocation5] sm:$0x1] %vm494_vm3, %v1156_v0  ;;  %498 = vst.msk [vmem:[#allocation5 + $0x11] sm:$0x1] %vm494_vm3, %v1156_v0 }
  0xa0   : > { %v394_v30 = vmul.f32 %v1498_v20, %v1498_v20  ;;  %v411_v31 = vmul.f32 %v1501_v21, %v1501_v21  ;;  %v401_v32 = vadd.f32 %v809_v28, %v382_v27  ;;  %s592_s16 = scalar_lea.sflag [#allocation16], %s1421_s23  ;;  %s1042_s6 = scalar_lea.vmem %s1530_s0, 256 }
  0xa1   : > { %v417_v34 = vadd.f32 %v814_v24, %v400_v26  ;;  %v412_v35 = vadd.f32 %v410_v19, %v395_v29  ;;  %p1043_p13 = scmp.ne.s32.totalorder %s1530_s0, %s1042_s6  ;;  %p1664_p0 = scmp.ne.s32.totalorder %s1652_s29, 0 }
  0xa2   : > { %v396_v36 = vadd.f32 %v394_v30, %v378_v25  ;;  %v418_v37 = vadd.f32 %v815_v33, %v401_v32  ;;  %s1160_s26 = smov [#allocation15]  }
  0xa3   : > { %442 = vrot.lane.b32.xlu1 %v417_v34, %s1157_s28  ;;  %431 = vrot.lane.b32.xlu0 %v412_v35, %s1157_s28  ;;  %v529_v35 = vld [vmem:[%s1449_s20 + $0x8] sm:$0xff]  ;;  %p1044_p8 = pnand %p1043_p13, %p1664_p0  ;;  %s1046_s17 = sshll.u32 %s1160_s26, 4  ;;  %s1047_s17 = int_to_ptr.vmem [resolvable:$false] %s1046_s17 }
  0xa4   : > { %v413_v38 = vadd.f32 %v411_v31, %v396_v36  ;;  %v528_v31 = vld [vmem:[%s1449_s20] sm:$0xff]  ;;  %s1048_s11 = scalar_lea.vmem %s1047_s17, 512  ;;  %p1049_p11 = scmp.lt.s32.totalorder %s1530_s0, %s1047_s17 }
  0xa5   : > { %p1045_p10 = pneg %p1044_p8  ;;  %p1050_p4 = scmp.lt.s32.totalorder %s1048_s11, %s1042_s6 }
  0xa7   : > { %444 = vrot.lane.b32.xlu1 %v418_v37, %s1157_s28  ;;  %433 = vrot.lane.b32.xlu0 %v413_v38, %s1157_s28  ;;  %p1051_p3 = por %p1050_p4, %p1049_p11 }
  0xa9   : > { %p1052_p5 = pnand %p1051_p3, %p1045_p10 }
 0x115   : > { %v443_v39 = vpop.permute.xlu1 %442  ;;  %v432_v40 = vpop.permute.xlu0 %431 }
 0x116   : > { %448 = vst.msk [vmem:[#allocation3] sm:$0xff] %vm437_vm2, %v443_v39  ;;  %438 = vst.msk [vmem:[#allocation2] sm:$0xff] %vm437_vm2, %v432_v40 }
 0x119   : > { %v445_v41 = vpop.permute.xlu1 %444  ;;  %v434_v42 = vpop.permute.xlu0 %433 }
 0x11a   : > { %449 = vst.msk [vmem:[#allocation3 + $0x8] sm:$0xff] %vm437_vm2, %v445_v41  ;;  %439 = vst.msk [vmem:[#allocation2 + $0x8] sm:$0xff] %vm437_vm2, %v434_v42 }
 0x11d   : > { %v450_v43 = vld [vmem:[#allocation2] sm:$0xff]  ;;  %v454_v45 = vld [vmem:[#allocation3] sm:$0xff] }
 0x11e   : > { %460 = vrot.lane.b32.xlu0 %v450_v43, %s1158_s12 }
 0x121   : > { %v451_v44 = vld [vmem:[#allocation2 + $0x8] sm:$0xff]  ;;  %v455_v46 = vld [vmem:[#allocation3 + $0x8] sm:$0xff] }
 0x122   : > { %478 = vrot.lane.b32.xlu0 %v450_v43, %s1159_s27  ;;  %462 = vrot.lane.b32.xlu1 %v451_v44, %s1158_s12 }
 0x126   : > { %470 = vrot.lane.b32.xlu0 %v454_v45, %s1158_s12  ;;  %480 = vrot.lane.b32.xlu1 %v451_v44, %s1159_s27 }
 0x12a   : > { %486 = vrot.lane.b32.xlu0 %v454_v45, %s1159_s27  ;;  %472 = vrot.lane.b32.xlu1 %v455_v46, %s1158_s12 }
 0x12e   : > { %488 = vrot.lane.b32.xlu1 %v455_v46, %s1159_s27 }
 0x190   : > { %v461_v47 = vpop.permute.xlu0 %460 }
 0x191   : > { %v466_v48 = vadd.f32 %v461_v47, %v450_v43 }
 0x194   : > { %v463_v49 = vpop.permute.xlu1 %462  ;;  %v479_v50 = vpop.permute.xlu0 %478 }
 0x195   : > { %v484_v51 = vadd.f32 %v479_v50, %v466_v48  ;;  %v467_v52 = vadd.f32 %v463_v49, %v451_v44 }
 0x197   : > { %500 = vst.msk [vmem:[#allocation4 + $0x1] sm:$0xff] %vm499_vm4, %v484_v51 }
 0x198   : > { %v481_v53 = vpop.permute.xlu1 %480  ;;  %v471_v54 = vpop.permute.xlu0 %470 }
 0x199   : > { %v485_v55 = vadd.f32 %v481_v53, %v467_v52  ;;  %v476_v56 = vadd.f32 %v471_v54, %v454_v45 }
 0x19b   : > { %501 = vst.msk [vmem:[#allocation4 + $0x9] sm:$0xff] %vm499_vm4, %v485_v55 }
 0x19c   : > { %v473_v57 = vpop.permute.xlu1 %472  ;;  %v487_v58 = vpop.permute.xlu0 %486 }
 0x19d   : > { %v492_v59 = vadd.f32 %v487_v58, %v476_v56  ;;  %v477_v62 = vadd.f32 %v473_v57, %v455_v46 }
 0x19e   : > { %v504_v60 = vld [vmem:[#allocation4] sm:$0xff] }
 0x19f   : > { %v512_v61 = vld [vmem:[#allocation4 + $0x1] sm:$0xff]  ;;  %502 = vst.msk [vmem:[#allocation5 + $0x1] sm:$0xff] %vm499_vm4, %v492_v59 }
 0x1a0   : > { %v489_v63 = vpop.permute.xlu1 %488  ;;  %v514_v0 = vadd.f32 %v512_v61, %v504_v60 }
 0x1a1   : > { %v493_v1 = vadd.f32 %v489_v63, %v477_v62 }
 0x1a2   : > { %v505_v3 = vld [vmem:[#allocation4 + $0x8] sm:$0xff] }
 0x1a3   : > { %v513_v6 = vld [vmem:[#allocation4 + $0x9] sm:$0xff]  ;;  %503 = vst.msk [vmem:[#allocation5 + $0x9] sm:$0xff] %vm499_vm4, %v493_v1 }
 0x1a4   : > { %v520_v10 = vld [vmem:[#allocation4 + $0x2] sm:$0xff]  ;;  %v515_v12 = vadd.f32 %v513_v6, %v505_v3  ;;  %v521_v16 = vld [vmem:[#allocation4 + $0xa] sm:$0xff] }
 0x1a5   : > { %v522_v13 = vadd.f32 %v520_v10, %v514_v0 }
 0x1a6   : > { %v523_v18 = vadd.f32 %v521_v16, %v515_v12  ;;  %v508_v22 = vld [vmem:[#allocation5] sm:$0xff] }
 0x1a7   : > { %v534_v19 = vmax.f32 %v522_v13, 1e-08  ;;  %v516_v23 = vld [vmem:[#allocation5 + $0x1] sm:$0xff] }
 0x1a8   : > { %v535_v24 = vmax.f32 %v523_v18, 1e-08  ;;  %v518_v25 = vadd.f32 %v516_v23, %v508_v22 }
 0x1a9   : > { %918 = vrcp.f32 %v534_v19 }
 0x1aa   : > { %920 = vrcp.f32 %v535_v24  ;;  %v509_v26 = vld [vmem:[#allocation5 + $0x8] sm:$0xff] }
 0x1ab   : > { %v517_v27 = vld [vmem:[#allocation5 + $0x9] sm:$0xff] }
 0x1ac   : > { %v524_v28 = vld [vmem:[#allocation5 + $0x2] sm:$0xff]  ;;  %v519_v29 = vadd.f32 %v517_v27, %v509_v26  ;;  %v525_v32 = vld [vmem:[#allocation5 + $0xa] sm:$0xff] }
 0x1ad   : > { %v526_v30 = vadd.f32 %v524_v28, %v518_v25 }
 0x1ae   : > { %v527_v33 = vadd.f32 %v525_v32, %v519_v29 }
 0x1af   : > { %v530_v34 = vmul.f32 25.0, %v526_v30 }
 0x1b0   : > { %v531_v36 = vmul.f32 25.0, %v527_v33 }
 0x1b1   : > { %v532_v37 = vmul.f32 %v530_v34, %v528_v31 }
 0x1b2   : > { %v533_v39 = vmul.f32 %v531_v36, %v529_v35 }
 0x1b3   : > { %v919_v38 = vpop.eup %918 }
 0x1b4   : > { %v538_v40 = vmul.f32 %v919_v38, %v532_v37  ;;  %v921_v41 = vpop.eup %920 }
 0x1b5   : > { %v539_v42 = vmul.f32 %v921_v41, %v533_v39 }
 0x1b6   : > { %v540_v43 = vmax.f32 %v538_v40, 0.0 }
 0x1b7   : > { %v541_v44 = vmax.f32 %v539_v42, 0.0 }
 0x1b8   : > { %v542_v45 = vmin.f32 %v540_v43, 1.0 }
 0x1b9   : > { %v543_v46 = vmin.f32 %v541_v44, 1.0 }
 0x1ba   : > { %v546_v47 = vsub.f32 1.0, %v542_v45  ;;  %544 = vst.msk [vmem:[%s370_s10] sm:$0xff] %vm499_vm4, %v542_v45 }
 0x1bb   : > { %v547_v48 = vsub.f32 1.0, %v543_v46  ;;  %545 = vst.msk [vmem:[%s370_s10 + $0x8] sm:$0xff] %vm499_vm4, %v543_v46 }
 0x1bc   : > { %v554_v49 = vmul.f32 %v546_v47, %v1461_v4  ;;  %v566_v50 = vmul.f32 %v546_v47, %v1471_v8  ;;  %v579_v51 = vmul.f32 %v546_v47, %v1474_v9 }
 0x1bd   : > { %1055 = shalt.err (!%p1052_p5)
}
 0x1be   : > { %s1056_s13 = scalar_lea.hbm %s1528_s7, 256  ;;  %s1060_s28 = scalar_lea.hbm %s1639_s5, 512 }
 0x1bf   : > { %p1057_p1 = scmp.ne.s32.totalorder %s1528_s7, %s1056_s13  ;;  %p1061_p12 = scmp.lt.u32.totalorder %s1528_s7, %s1639_s5 }
 0x1c0   : > { %p1062_p2 = scmp.lt.u32.totalorder %s1060_s28, %s1056_s13  ;;  %p1064_p13 = scmp.lt.u32.totalorder %s1056_s13, %s1528_s7 }
 0x1c1   : > { %p1058_p7 = pnand %p1057_p1, %p1664_p0 }
 0x1c2   : > { %p1063_p6 = por %p1062_p2, %p1061_p12 }
 0x1c3   : > { %p1059_p9 = pneg %p1058_p7 }
 0x1c4   : > { %p1065_p8 = por %p1064_p13, %p1063_p6 }
 0x1c6   : > { %p1066_p10 = pnand %p1065_p8, %p1059_p9 }
 0x1c8   : > { %1069 = shalt.err (!%p1066_p10)
}
 0x1c9   : > { %s1161_s14 = smov 128   ;;  %s1162_s10 = smov 8   ;;  %v555_v4 = vmul.f32 %v547_v48, %v1484_v14  ;;  %v556_v8 = vadd.f32 %v554_v49, %v1457_v2  ;;  %v567_v9 = vmul.f32 %v547_v48, %v1498_v20  ;;  %v568_v52 = vadd.f32 %v1464_v5, %v566_v50 }
 0x1ca   : > { %853 = dma.vmem_to_hbm [thread:$0]  (%p1664_p0), %s1530_s0, 256, %s1528_s7, %s592_s16, %s1161_s14, %s1161_s14, %s1162_s10   ;;  %v580_v53 = vmul.f32 %v547_v48, %v1501_v21  ;;  %v581_v54 = vadd.f32 %v1468_v7, %v579_v51 }
 0x1cb   : > { %s363_s1 = scalar_lea.vmem [#allocation14], %s1424_s15  ;;  %v557_v55 = vadd.f32 %v555_v4, %v1478_v11  ;;  %v569_v14 = vadd.f32 %v1487_v15, %v567_v9  ;;  %s1582_s7 = scalar_lea.hbm %s1638_s4, %s843_s9 }
 0x1cc   : > { %s605_s25 = sshll.u32 %s363_s1, 4  ;;  %558 = vst.msk [vmem:[%s363_s1] sm:$0xff] %vm499_vm4, %v556_v8  ;;  %820 = vst.msk [vmem:[%s363_s1 + $0x10] sm:$0xff] %vm499_vm4, %v568_v52  ;;  %v582_v2 = vadd.f32 %v1491_v17, %v580_v53  ;;  %s587_s16 = scalar_lea.sflag [#allocation8], %s1421_s23  ;;  %s1584_s25 = int_to_ptr.vmem [resolvable:$true] %s605_s25 }
 0x1cd   : > { %826 = vst.msk [vmem:[%s363_s1 + $0x20] sm:$0xff] %vm499_vm4, %v581_v54  ;;  %559 = vst.msk [vmem:[%s363_s1 + $0x8] sm:$0xff] %vm499_vm4, %v557_v55  ;;  %s1070_s6 = scalar_lea.vmem %s1584_s25, 768  ;;  %s1163_s22 = smov [#allocation14]  }
 0x1ce   : > { %821 = vst.msk [vmem:[%s363_s1 + $0x18] sm:$0xff] %vm499_vm4, %v569_v14  ;;  %827 = vst.msk [vmem:[%s363_s1 + $0x28] sm:$0xff] %vm499_vm4, %v582_v2  ;;  %p1071_p11 = scmp.ne.s32.totalorder %s1584_s25, %s1070_s6  ;;  %s1074_s9 = sshll.u32 %s1163_s22, 4  ;;  %s1075_s9 = int_to_ptr.vmem [resolvable:$false] %s1074_s9 }
 0x1cf   : > { %s1076_s26 = scalar_lea.vmem %s1075_s9, 1536  ;;  %p1077_p5 = scmp.lt.s32.totalorder %s1584_s25, %s1075_s9 }
 0x1d0   : > { %p1072_p4 = pnand %p1071_p11, %p1664_p0  ;;  %p1078_p1 = scmp.lt.s32.totalorder %s1076_s26, %s1070_s6 }
 0x1d2   : > { %p1073_p3 = pneg %p1072_p4  ;;  %p1079_p7 = por %p1078_p1, %p1077_p5 }
 0x1d4   : > { %p1080_p9 = pnand %p1079_p7, %p1073_p3 }
 0x1d6   : > { %1083 = shalt.err (!%p1080_p9)
}
 0x1d7   : > { %s1084_s17 = scalar_lea.hbm %s1582_s7, 768  ;;  %s1088_s8 = scalar_lea.hbm %s1638_s4, 1536 }
 0x1d8   : > { %p1085_p12 = scmp.ne.s32.totalorder %s1582_s7, %s1084_s17  ;;  %p1089_p13 = scmp.lt.u32.totalorder %s1582_s7, %s1638_s4 }
 0x1d9   : > { %p1090_p8 = scmp.lt.u32.totalorder %s1088_s8, %s1084_s17  ;;  %p1092_p11 = scmp.lt.u32.totalorder %s1084_s17, %s1582_s7 }
 0x1da   : > { %p1086_p2 = pnand %p1085_p12, %p1664_p0 }
 0x1db   : > { %p1091_p10 = por %p1090_p8, %p1089_p13 }
 0x1dc   : > { %p1087_p6 = pneg %p1086_p2 }
 0x1dd   : > { %p1093_p4 = por %p1092_p11, %p1091_p10 }
 0x1df   : > { %p1094_p3 = pnand %p1093_p4, %p1087_p6 }
 0x1e1   : > { %1097 = shalt.err (!%p1094_p3)
}
 0x1e2   : > { %852 = dma.vmem_to_hbm [thread:$0]  (%p1664_p0), %s1584_s25, 768, %s1582_s7, %s587_s16, %s1161_s14, %s1161_s14, %s1162_s10  }
 0x1e3 PF: > { %s636_s12 = sand.u32 1, %s1136_s18   ;;  %p1665_p5 = scmp.ne.s32.totalorder %s1653_s30, 0 }
 0x1e4   : > { %p1666_p1 = scmp.ge.s32.totalorder %s1148_s21, 2  ;;  %s637_s27 = scalar_lea.sflag [#allocation8], %s636_s12 }
 0x1e6   : > { %p870_p7 = pnand %p1666_p1, %p1665_p5 }
 0x1e8   : > { %1127 = dma.done.wait (!%p870_p7), %s637_s27, 768  }
 0x1e9   : > { %1129 = vsyncadd (!%p870_p7), %s637_s27, 4294966528  ;;  %s646_s29 = scalar_lea.sflag [#allocation16], %s636_s12 }
 0x1ea   : > { %1131 = dma.done.wait (!%p870_p7), %s646_s29, 256  }
 0x1eb   : > { %1133 = vsyncadd (!%p870_p7), %s646_s29, 4294967040  ;;  %s1667_s23 = sld [smem:[#allocation22_spill]]  ;;  %s1668_s20 = sld [smem:[#allocation23_spill]] }
 0x1ec   : > { %p28_p0 = scmp.ge.s32.totalorder %s1219_s24, 4   ;;  %s1669_s18 = smov %s1140_s19 }
 0x1ed   : > { %s1671_s21 = smov %s1219_s24 }
 0x1ee   :  { %30 = sbr.rel (!%p28_p0) target bundleno = 14 (0xe), region = 143 }
 0x1f1   : > { %s1670_s19 = smov %s1667_s23 }
 0x1f5   :  { %651 = vsyncpa [#allocation7], 1 }
 0x1f6   :  { %653 = vsyncpa [#allocation7 + $0x1], 1 }
 0x1f7   :  { %654 = vsyncpa [#allocation10], 1 }
 0x1f8   :  { %656 = vsyncpa [#allocation10 + $0x1], 1 }
 0x1f9   :  { %657 = vsyncpa [#allocation13], 1 }
 0x1fa   :  { %659 = vsyncpa [#allocation13 + $0x1], 1 }
 0x1fb   :  { %660 = vsyncpa [#allocation8], 1 }
 0x1fc   :  { %662 = vsyncpa [#allocation8 + $0x1], 1 }
 0x1fd   :  { %663 = vsyncpa [#allocation16], 1 }
 0x1fe   :  { %665 = vsyncpa [#allocation16 + $0x1], 1 }

</bundles_post_ra>
